<compile_context>
chip_gen: v5e
topology: v5e:2x2
jax: 0.10.0
libtpu: 0.0.40
codegen_flags: <defaults>
</compile_context>

<pallas_src>
import functools
import math

import jax
import jax.numpy as jnp
from jax.experimental import pallas as pl
from jax.experimental.pallas import tpu as pltpu


_LANE = 128


def _round_up(x, m):
    return (x + m - 1) // m * m


# ----------------------------------------------------------------------------
# Generation-aware hardware queries (safe fallbacks if unavailable)
# ----------------------------------------------------------------------------
def _vmem_budget_bytes():
    """~75% of physical VMEM (≈48 MiB on v7x, ≈96 MiB on v5e/v6e)."""
    try:
        phys = int(pltpu.get_tpu_info().vmem_capacity_bytes)
    except Exception:
        phys = 64 * 1024 * 1024          # conservative (v7x-sized) fallback
    return (phys * 3) // 4


def _is_v5e():
    try:
        kind = jax.devices()[0].device_kind.lower()
    except Exception:
        return False
    return ("v5e" in kind) or ("v5 lite" in kind) or ("v5litepod" in kind)


# ----------------------------------------------------------------------------
# Pallas kernels
# ----------------------------------------------------------------------------
def _mm_relu_direct_kernel(x_ref, w_ref, o_ref, *, relu):
    """Single-K-step matmul: no scratch, no accumulator copy, fused ReLU."""
    y = jnp.dot(x_ref[...], w_ref[...], preferred_element_type=jnp.float32)
    if relu:
        y = jnp.maximum(y, 0.0)
    o_ref[...] = y.astype(o_ref.dtype)


def _mm_relu_acc_kernel(x_ref, w_ref, o_ref, acc_ref, *, relu):
    """K-tiled matmul with f32 VMEM accumulator; ReLU fused into last K step."""
    @pl.when(pl.program_id(2) == 0)
    def _init():
        acc_ref[...] = jnp.zeros_like(acc_ref)

    acc_ref[...] += jnp.dot(x_ref[...], w_ref[...],
                            preferred_element_type=jnp.float32)

    @pl.when(pl.program_id(2) == pl.num_programs(2) - 1)
    def _finalize():
        y = acc_ref[...]
        if relu:
            y = jnp.maximum(y, 0.0)
        o_ref[...] = y.astype(o_ref.dtype)


# ----------------------------------------------------------------------------
# Unified tile selection
# ----------------------------------------------------------------------------
def _choose_tm(M, fits):
    """Largest M-tile fitting the VMEM budget. Multiples of 16 (bf16 sublane
    packing); for large M keep >= 2 M-tiles so both v7x TensorCores get work."""
    m_min = _round_up(max(int(M), 1), 16)
    if m_min <= 256:
        cands = [m_min]
    else:
        cands = sorted({c for c in (1024, 512, 256, 128)
                        if c <= m_min // 2 or c == 128}, reverse=True)
    cands += [c for c in (128, 64, 32, 16) if c < cands[-1]]
    for c in cands:
        if fits(c):
            return c
    return cands[-1]


def _fused_matmul_relu(cols, wmat, relu, out_dtype=jnp.float32):
    """cols: (M, K_pad) bf16; wmat: (K_pad, N_pad) bf16 (both lane-padded).
    Returns relu(cols @ wmat) as (M, N_pad) in out_dtype."""
    M, K_pad = cols.shape
    Kw, N_pad = wmat.shape
    assert K_pad == Kw and K_pad % _LANE == 0 and N_pad % _LANE == 0

    budget = _vmem_budget_bytes()
    out_bytes = jnp.dtype(out_dtype).itemsize
    w_bytes = K_pad * N_pad * 2                     # bf16 weight matrix

    # ------- Path A: weight fully VMEM-resident, whole K in one block -------
    # (the common conv case: K = kh*kw*Cin and N = Cout are both small)
    def a_fits(tm):
        return (2 * tm * K_pad * 2              # double-buffered bf16 activations
                + 2 * w_bytes                   # resident weight (2x to be safe)
                + 2 * tm * N_pad * out_bytes    # double-buffered output
                ) <= budget

    if w_bytes <= min(budget // 3, 16 * 1024 * 1024) and a_fits(16):
        tm = _choose_tm(M, a_fits)
        M_pad = _round_up(M, tm)
        if M_pad != M:
            cols = jnp.pad(cols, ((0, M_pad - M), (0, 0)))

        out = pl.pallas_call(
            functools.partial(_mm_relu_direct_kernel, relu=relu),
            out_shape=jax.ShapeDtypeStruct((M_pad, N_pad), out_dtype),
            grid_spec=pltpu.PrefetchScalarGridSpec(
                num_scalar_prefetch=0,
                grid=(M_pad // tm,),
                in_specs=[
                    pl.BlockSpec((tm, K_pad), lambda i: (i, 0)),
                    # Constant block index -> weight stays resident in VMEM and
                    # is DMA'd once instead of on every grid step.
                    pl.BlockSpec((K_pad, N_pad), lambda i: (0, 0)),
                ],
                out_specs=pl.BlockSpec((tm, N_pad), lambda i: (i, 0)),
            ),
            compiler_params=pltpu.CompilerParams(
                dimension_semantics=("parallel",),
                vmem_limit_bytes=budget,
            ),
        )(cols, wmat)
        return out[:M]

    # ------- Path B: fully tiled (M, N, K) matmul with f32 accumulator -------
    tn = 256 if (N_pad % 256 == 0 and N_pad >= 256 and not _is_v5e()) else 128
    tk = 512 if K_pad % 512 == 0 else (256 if K_pad % 256 == 0 else 128)

    def b_fits(tm):
        return (2 * tm * tk * 2 + 2 * tk * tn * 2
                + 2 * tm * tn * out_bytes + tm * tn * 4) <= budget

    tm = _choose_tm(M, b_fits)
    M_pad = _round_up(M, tm)
    if M_pad != M:
        cols = jnp.pad(cols, ((0, M_pad - M), (0, 0)))

    grid = (M_pad // tm, N_pad // tn, K_pad // tk)
    out = pl.pallas_call(
        functools.partial(_mm_relu_acc_kernel, relu=relu),
        out_shape=jax.ShapeDtypeStruct((M_pad, N_pad), out_dtype),
        grid_spec=pltpu.PrefetchScalarGridSpec(
            num_scalar_prefetch=0,
            grid=grid,
            in_specs=[
                pl.BlockSpec((tm, tk), lambda i, j, k: (i, k)),
                pl.BlockSpec((tk, tn), lambda i, j, k: (k, j)),
            ],
            out_specs=pl.BlockSpec((tm, tn), lambda i, j, k: (i, j)),
            scratch_shapes=[pltpu.VMEM((tm, tn), jnp.float32)],
        ),
        compiler_params=pltpu.CompilerParams(
            dimension_semantics=("parallel", "parallel", "arbitrary"),
            vmem_limit_bytes=budget,
        ),
    )(cols, wmat)
    return out[:M]


# ----------------------------------------------------------------------------
# JAX glue: im2col (data movement only, done in bf16)
# ----------------------------------------------------------------------------
def _im2col_nhwc(x, kh, kw, stride, dilation):
    """x: NHWC (already reflection-padded). Returns (B*Ho*Wo, kh*kw*C) patches
    with (kh, kw, C) channel ordering."""
    B, H, W, C = x.shape
    Ho = (H - dilation * (kh - 1) - 1) // stride + 1
    Wo = (W - dilation * (kw - 1) - 1) // stride + 1
    taps = []
    for ih in range(kh):
        for iw in range(kw):
            h0 = ih * dilation
            w0 = iw * dilation
            taps.append(x[:, h0:h0 + (Ho - 1) * stride + 1:stride,
                          w0:w0 + (Wo - 1) * stride + 1:stride, :])
    patches = jnp.concatenate(taps, axis=-1)            # (B, Ho, Wo, kh*kw*C)
    return patches.reshape(B * Ho * Wo, kh * kw * C), (B, Ho, Wo)


# ----------------------------------------------------------------------------
# Module port
# ----------------------------------------------------------------------------
class Conv2DActiva:
    """Port of Conv2D_activa: ReflectionPad2d(p) -> Conv2d(no bias) -> optional ReLU."""

    def __init__(self, weight, *, stride=1, padding=0, dilation=1,
                 activation='relu', out_dtype=jnp.float32):
        # weight: PyTorch layout (Cout, Cin, kh, kw), float32
        self.stride = int(stride)
        self.padding = int(padding)
        self.dilation = int(dilation)
        self.relu = (activation == 'relu')
        self.out_dtype = out_dtype
        # TODO(synk): any truthy non-'relu' activation string would crash in the
        #             PyTorch module (it calls the raw string); treated as identity.

        cout, cin, kh, kw = weight.shape
        self.cout, self.cin, self.kh, self.kw = cout, cin, kh, kw
        K = kh * kw * cin
        self.K = K
        self.K_pad = _round_up(K, _LANE)
        # N padding: to 256 on v6e/v7x when Cout > 128 (feeds the 2x256^2 MXU),
        # else to 128 (v5e's 4x128^2 MXU is native at 128).
        n_mult = 256 if (cout > 128 and not _is_v5e()) else _LANE
        self.N_pad = _round_up(cout, n_mult)

        # (Cout, Cin, kh, kw) -> (kh, kw, Cin, Cout) -> (K, Cout); bf16; padded
        # once at construction time (not per forward call).
        wmat = jnp.transpose(weight, (2, 3, 1, 0)).reshape(K, cout)
        wmat = wmat.astype(jnp.bfloat16)
        self.wmat = jnp.pad(wmat, ((0, self.K_pad - K), (0, self.N_pad - cout)))

    def __call__(self, x_nchw):
        # NCHW (PyTorch) -> NHWC; cast to bf16 BEFORE pad/im2col so the patch
        # matrix is materialized in bf16 (halves im2col HBM traffic).
        x = jnp.transpose(x_nchw, (0, 2, 3, 1)).astype(jnp.bfloat16)

        if self.padding:
            p = self.padding
            x = jnp.pad(x, ((0, 0), (p, p), (p, p), (0, 0)), mode="reflect")

        cols, (B, Ho, Wo) = _im2col_nhwc(x, self.kh, self.kw,
                                         self.stride, self.dilation)
        if self.K_pad != self.K:
            cols = jnp.pad(cols, ((0, 0), (0, self.K_pad - self.K)))

        out = _fused_matmul_relu(cols, self.wmat, self.relu,
                                 out_dtype=self.out_dtype)
        out = out[:, :self.cout].reshape(B, Ho, Wo, self.cout)
        return jnp.transpose(out, (0, 3, 1, 2))          # back to NCHW


# ----------------------------------------------------------------------------
# Test
# ----------------------------------------------------------------------------
if __name__ == "__main__":
    key = jax.random.PRNGKey(0)
    wkey, xkey = jax.random.split(key)

    B, Cin, H, W = 2, 4, 16, 16
    Cout, ksize, stride, padding = 32, 3, 1, 1

    weight = jax.random.normal(wkey, (Cout, Cin, ksize, ksize), jnp.float32)
    weight = weight * math.sqrt(2.0 / (Cin * ksize * ksize))
    x = jax.random.normal(xkey, (B, Cin, H, W), jnp.float32)

    conv = Conv2DActiva(weight, stride=stride, padding=padding,
                        dilation=1, activation='relu')
    fwd = jax.jit(conv.__call__)
    out = jax.block_until_ready(fwd(x))

    Ho = (H + 2 * padding - ksize) // stride + 1
    Wo = (W + 2 * padding - ksize) // stride + 1
    assert out.shape == (B, Cout, Ho, Wo), out.shape
    assert bool(jnp.all(jnp.isfinite(out)))

    # Reference: same reflection pad + XLA conv (f32, HIGHEST precision) + ReLU.
    xp = jnp.pad(x, ((0, 0), (0, 0), (padding, padding), (padding, padding)),
                 mode="reflect")
    ref = jax.lax.conv_general_dilated(
        xp, weight, window_strides=(stride, stride), padding="VALID",
        dimension_numbers=("NCHW", "OIHW", "NCHW"),
        precision=jax.lax.Precision.HIGHEST,
        preferred_element_type=jnp.float32)
    ref = jnp.maximum(ref, 0.0)
    # NOTE: bf16 inputs vs f32 reference -> loose tolerance (inference tradeoff).
    assert bool(jnp.allclose(out, ref, rtol=5e-2, atol=5e-2)), \
        float(jnp.max(jnp.abs(out - ref)))

    print("KERNEL_OK")
</pallas_src>

<mosaic_0001>
module attributes {stable_mosaic.version = 11 : i64} {
  func.func @_mm_relu_direct_kernel(%arg0: i32, %arg1: memref<256x128xbf16, #tpu.memory_space<vmem>>, %arg2: memref<128x128xbf16, #tpu.memory_space<vmem>>, %arg3: memref<256x128xf32, #tpu.memory_space<vmem>>) attributes {dimension_semantics = [#tpu.dimension_semantics<parallel>], iteration_bounds = array<i64: 2>, scalar_prefetch = 0 : i64, scratch_operands = 0 : i64, tpu.core_type = #tpu.core_type<tc>, window_params = [{transform_indices = @transform_0, window_bounds = array<i64: 256, 128>}, {pipeline_mode = #tpu.pipeline_mode<synchronous>, transform_indices = @transform_1, window_bounds = array<i64: 128, 128>}, {transform_indices = @transform_2, window_bounds = array<i64: 256, 128>}]} {
    %c0 = arith.constant 0 : index
    %c0_0 = arith.constant 0 : index
    %0 = vector.load %arg1[%c0, %c0_0] : memref<256x128xbf16, #tpu.memory_space<vmem>>, vector<256x128xbf16>
    %c0_1 = arith.constant 0 : index
    %c0_2 = arith.constant 0 : index
    %1 = vector.load %arg2[%c0_1, %c0_2] : memref<128x128xbf16, #tpu.memory_space<vmem>>, vector<128x128xbf16>
    %cst = arith.constant dense<0.000000e+00> : vector<256x128xf32>
    %2 = tpu.matmul %0, %1, %cst {dimension_numbers = #tpu.dot_dimension_numbers<[1], [0], [0], [1], [0, 0, 1, 1], [], []>} : vector<256x128xbf16>, vector<128x128xbf16>, vector<256x128xf32> -> vector<256x128xf32>
    %cst_3 = arith.constant 0.000000e+00 : f32
    %3 = vector.broadcast %cst_3 : f32 to vector<256x128xf32>
    %4 = arith.maximumf %2, %3 : vector<256x128xf32>
    %c0_4 = arith.constant 0 : index
    %c0_5 = arith.constant 0 : index
    %5 = vector.load %arg3[%c0_4, %c0_5] : memref<256x128xf32, #tpu.memory_space<vmem>>, vector<256x128xf32>
    tpu.vector_store %arg3[%c0_4, %c0_5], %4 {strides = array<i32>} : memref<256x128xf32, #tpu.memory_space<vmem>>, vector<256x128xf32>,
    return
  }
  func.func @transform_0(%arg0: i32) -> (i32, i32) {
    %c0_i32 = arith.constant 0 : i32
    %c0_i32_0 = arith.constant 0 : i32
    return %arg0, %c0_i32 : i32, i32
  }
  func.func @transform_1(%arg0: i32) -> (i32, i32) {
    %c0_i32 = arith.constant 0 : i32
    %c0_i32_0 = arith.constant 0 : i32
    %c0_i32_1 = arith.constant 0 : i32
    return %c0_i32, %c0_i32_0 : i32, i32
  }
  func.func @transform_2(%arg0: i32) -> (i32, i32) {
    %c0_i32 = arith.constant 0 : i32
    %c0_i32_0 = arith.constant 0 : i32
    return %arg0, %c0_i32 : i32, i32
  }
}

</mosaic_0001>

<bundles_post_ra>
// kernel: a_call__.1
= control target key start
LH: loop header
LB: loop body
LE: loop exit
PB: predicated region body
PF: predicated region fallthrough
CT: control target
= control target key end

     0   :  { %7 = vsyncpa [#allocation3], 0  ;;  %s1012_s0 = inlined_call_operand.vmem [shape: bf16[512,128], index: 0, kind: input, shape index: {}]   ;;  %s1013_s1 = inlined_call_operand.vmem [shape: bf16[128,128], index: 1, kind: input, shape index: {}]   ;;  %s1014_s2 = inlined_call_operand.hbm [shape: f32[512,128], index: 2, kind: output, shape index: {}]  }
   0x1   :  { %9 = vsyncpa [#allocation3 + $0x1], 0  ;;  %s847_s9 = smov 0   ;;  %s849_s10 = smov 0  }
   0x2   :  { %s851_s11 = smov 0   ;;  %s853_s12 = smov 0  }
   0x3 LB: > { %s868_s13 = sadd.s32 4294967295, %s828_s12   ;;  %s568_s14 = sadd.s32 4294967294, %s828_s12   ;;  %s828_s12 = sphi %s853_s12, %s1020_s12   ;;  %s824_s11 = sphi %s851_s11, %s1019_s11   ;;  %s820_s10 = sphi %s849_s10, %s1018_s10   ;;  %s816_s9 = sphi %s847_s9, %s1017_s9  }
   0x4   : > { %s872_s15 = sadd.s32 1, %s828_s12   ;;  %s69_s16 = sadd.s32 1, %s824_s11 }
   0x5   : > { %s66_s17 = ssub.s32 %s828_s12, %s872_s15  ;;  %p79_p0 = scmp.ne.s32.totalorder %s824_s11, %s820_s10 }
   0x6   : > { %p67_p1 = scmp.eq.s32.totalorder %s66_s17, 0  ;;  %p80_p2 = scmp.eq.s32.totalorder %s868_s13, 1 }
   0x7   : > { %p85_p3 = scmp.ne.s32.totalorder %s820_s10, %s816_s9  ;;  %p86_p4 = scmp.eq.s32.totalorder %s568_s14, 1 }
   0x8   : > { %s883_s18 = scalar_select %p67_p1, %s824_s11, %s69_s16  }
   0x9   : > { %p885_p5 = por %p80_p2, %p79_p0  ;;  %p889_p6 = por %p86_p4, %p85_p3 }
   0xa   : > { %p571_p7 = scmp.ge.s32.totalorder %s828_s12, 1  ;;  %p116_p8 = scmp.lt.s32.totalorder %s828_s12, 3 }
   0xc   : > { %p117_p9 = pnand %p571_p7, %p116_p8 }
   0xd   : > { %s573_s29 = sshll.u32 (!%p117_p9), %s868_s13, 5  ;;  %s135_s23 = sand.u32 (!%p117_p9), 1, %s820_s10  }
   0xe   : > { %120 = sbr.rel (%p117_p9) target bundleno = 247 (0xf7), region = 28  ;;  %p139_p10 = scmp.lt.s32.totalorder (!%p117_p9), %s573_s29, 63 }
   0xf   : > { %s572_s24 = sshll.u32 (!%p117_p9), %s135_s23, 8  ;;  %s700_s26 = sshll.u32 (!%p117_p9), %s868_s13, 8 }
  0x10   : > { %s944_s25 = scalar_lea.vmem (!%p117_p9), [#allocation2], %s572_s24  ;;  %s491_s3 = scalar_lea.sflag (!%p117_p9), [#allocation3], %s135_s23 }
  0x11   : > { %s503_s30 = sshll.u32 (!%p117_p9), %s944_s25, 4  ;;  %s504_s30 = int_to_ptr.vmem [resolvable:$true] %s503_s30 }
  0x13   : > { %v699_v0 = vld [vmem:[%s1013_s1 + $0x38] sm:$0xff]  ;;  %v698_v1 = vld [vmem:[%s1013_s1 + $0x30] sm:$0xff]  ;;  %v697_v2 = vld [vmem:[%s1013_s1 + $0x28] sm:$0xff]  ;;  %s1022_s29 = smov (!%p139_p10, %s573_s29), 63 }
  0x14   : > { %337 = vmatpush.bf16.msra.mxu0 %v699_v0  ;;  %701 = vmatpush.bf16.msra.mxu1 %v699_v0  ;;  %v696_v3 = vld [vmem:[%s1013_s1 + $0x20] sm:$0xff]  ;;  %v695_v4 = vld [vmem:[%s1013_s1 + $0x18] sm:$0xff]  ;;  %v694_v5 = vld [vmem:[%s1013_s1 + $0x10] sm:$0xff]  ;;  %s574_s8 = sshll.u32 %s1022_s29, 2  ;;  %s502_s29 = scalar_lea.hbm %s1014_s2, %s700_s26 }
  0x15   : > { %702 = vmatpush.bf16.msra.mxu2 %v699_v0  ;;  %703 = vmatpush.bf16.msra.mxu3 %v699_v0  ;;  %v693_v6 = vld [vmem:[%s1013_s1 + $0x8] sm:$0xff]  ;;  %v692_v7 = vld [vmem:[%s1013_s1] sm:$0xff]  ;;  %s923_s22 = scalar_lea.vmem %s1012_s0, %s574_s8  ;;  %s505_s13 = sshll.u32 %s502_s29, 4  ;;  %s506_s13 = int_to_ptr.hbm [resolvable:$true] %s505_s13 }
  0x16   : > { %v676_v8 = vld [vmem:[%s923_s22] sm:$0xff]  ;;  %v677_v12 = vld [vmem:[%s923_s22 + $0x8] sm:$0xff]  ;;  %v678_v16 = vld [vmem:[%s923_s22 + $0x10] sm:$0xff]  ;;  %s780_s4 = sshra.s32 %s506_s13, 4  ;;  %s786_s8 = scalar_lea.hbm %s1014_s2, 512  ;;  %s781_s4 = int_to_ptr.hbm [resolvable:$true] %s780_s4 }
  0x17   : > { %v680_v9 = vld [vmem:[%s923_s22 + $0x20] sm:$0xff]  ;;  %v681_v13 = vld [vmem:[%s923_s22 + $0x28] sm:$0xff]  ;;  %v682_v17 = vld [vmem:[%s923_s22 + $0x30] sm:$0xff]  ;;  %s782_s5 = scalar_lea.hbm %s781_s4, 256  ;;  %p787_p0 = scmp.lt.s32.totalorder %s781_s4, %s1014_s2 }
  0x18   : > { %338 = vmatpush.bf16.msra.mxu0 %v698_v1  ;;  %704 = vmatpush.bf16.msra.mxu1 %v698_v1  ;;  %v684_v10 = vld [vmem:[%s923_s22 + $0x40] sm:$0xff]  ;;  %v685_v14 = vld [vmem:[%s923_s22 + $0x48] sm:$0xff]  ;;  %v686_v18 = vld [vmem:[%s923_s22 + $0x50] sm:$0xff]  ;;  %p783_p11 = scmp.ne.s32.totalorder %s781_s4, %s782_s5  ;;  %p788_p1 = scmp.lt.s32.totalorder %s786_s8, %s782_s5 }
  0x19   : > { %705 = vmatpush.bf16.msra.mxu2 %v698_v1  ;;  %706 = vmatpush.bf16.msra.mxu3 %v698_v1  ;;  %v688_v11 = vld [vmem:[%s923_s22 + $0x60] sm:$0xff]  ;;  %v689_v15 = vld [vmem:[%s923_s22 + $0x68] sm:$0xff]  ;;  %v690_v19 = vld [vmem:[%s923_s22 + $0x70] sm:$0xff] }
  0x1a   : > { %v679_v20 = vld [vmem:[%s923_s22 + $0x18] sm:$0xff]  ;;  %p784_p12 = pnand %p783_p11, %p885_p5  ;;  %p789_p2 = por %p788_p1, %p787_p0 }
  0x1b   : > { %v683_v21 = vld [vmem:[%s923_s22 + $0x38] sm:$0xff] }
  0x1c   : > { %339 = vmatpush.bf16.msra.mxu0 %v697_v2  ;;  %707 = vmatpush.bf16.msra.mxu1 %v697_v2  ;;  %v687_v22 = vld [vmem:[%s923_s22 + $0x58] sm:$0xff]  ;;  %p785_p13 = pneg %p784_p12 }
  0x1d   : > { %708 = vmatpush.bf16.msra.mxu2 %v697_v2  ;;  %709 = vmatpush.bf16.msra.mxu3 %v697_v2  ;;  %v691_v23 = vld [vmem:[%s923_s22 + $0x78] sm:$0xff] }
  0x1e   : > { %p790_p3 = pnand %p789_p2, %p785_p13 }
  0x20   : > { %340 = vmatpush.bf16.msra.mxu0 %v696_v3  ;;  %710 = vmatpush.bf16.msra.mxu1 %v696_v3 }
  0x21   : > { %711 = vmatpush.bf16.msra.mxu2 %v696_v3  ;;  %712 = vmatpush.bf16.msra.mxu3 %v696_v3 }
  0x24   : > { %341 = vmatpush.bf16.msra.mxu0 %v695_v4  ;;  %713 = vmatpush.bf16.msra.mxu1 %v695_v4 }
  0x25   : > { %714 = vmatpush.bf16.msra.mxu2 %v695_v4  ;;  %715 = vmatpush.bf16.msra.mxu3 %v695_v4 }
  0x28   : > { %342 = vmatpush.bf16.msra.mxu0 %v694_v5  ;;  %716 = vmatpush.bf16.msra.mxu1 %v694_v5 }
  0x29   : > { %717 = vmatpush.bf16.msra.mxu2 %v694_v5  ;;  %718 = vmatpush.bf16.msra.mxu3 %v694_v5 }
  0x2c   : > { %343 = vmatpush.bf16.msra.mxu0 %v693_v6  ;;  %719 = vmatpush.bf16.msra.mxu1 %v693_v6 }
  0x2d   : > { %720 = vmatpush.bf16.msra.mxu2 %v693_v6  ;;  %721 = vmatpush.bf16.msra.mxu3 %v693_v6 }
  0x30   : > { %344 = vmatpush.bf16.msra.mxu0 %v692_v7  ;;  %722 = vmatpush.bf16.msra.mxu1 %v692_v7 }
  0x31   : > { %723 = vmatpush.bf16.msra.mxu2 %v692_v7  ;;  %724 = vmatpush.bf16.msra.mxu3 %v692_v7 }
  0x33   : > { %345 = vmatmul.bf16.vlgmr.msra.gmra.mxu0 %v676_v8  ;;  %365 = vmatmul.bf16.vlgmr.msra.gmra.mxu1 %v680_v9 }
  0x34   : > { %385 = vmatmul.bf16.vlgmr.msra.gmra.mxu2 %v684_v10  ;;  %405 = vmatmul.bf16.vlgmr.msra.gmra.mxu3 %v688_v11 }
  0x43   : > { %350 = vmatmul.bf16.gmra.mxu0 %v677_v12  ;;  %370 = vmatmul.bf16.gmra.mxu1 %v681_v13 }
  0x44   : > { %390 = vmatmul.bf16.gmra.mxu2 %v685_v14  ;;  %410 = vmatmul.bf16.gmra.mxu3 %v689_v15 }
  0x53   : > { %355 = vmatmul.bf16.gmra.mxu0 %v678_v16  ;;  %375 = vmatmul.bf16.gmra.mxu1 %v682_v17 }
  0x54   : > { %395 = vmatmul.bf16.gmra.mxu2 %v686_v18  ;;  %415 = vmatmul.bf16.gmra.mxu3 %v690_v19 }
  0x63   : > { %360 = vmatmul.bf16.gmra.mxu0 %v679_v20  ;;  %380 = vmatmul.bf16.gmra.mxu1 %v683_v21 }
  0x64   : > { %400 = vmatmul.bf16.gmra.mxu2 %v687_v22  ;;  %420 = vmatmul.bf16.gmra.mxu3 %v691_v23 }
  0xb0   : > { %v346_v24 = vpop.f32.mrf.mxu0  ;;  %v366_v25 = vpop.f32.mrf.mxu1 }
  0xb1   : > { %v426_v26 = vmax.f32 %v346_v24, 0.0  ;;  %v434_v27 = vmax.f32 %v366_v25, 0.0 }
  0xb3   : > { %458 = vst [vmem:[%s944_s25] sm:$0xff] %v426_v26 }
  0xb4   : > { %466 = vst [vmem:[%s944_s25 + $0x40] sm:$0xff] %v434_v27 }
  0xb7   : > { %v386_v28 = vpop.f32.mrf.mxu2  ;;  %v406_v29 = vpop.f32.mrf.mxu3 }
  0xb8   : > { %v442_v30 = vmax.f32 %v386_v28, 0.0  ;;  %v450_v31 = vmax.f32 %v406_v29, 0.0  ;;  %v348_v32 = vpop.f32.mrf.mxu0  ;;  %v368_v33 = vpop.f32.mrf.mxu1 }
  0xb9   : > { %v427_v34 = vmax.f32 %v348_v32, 0.0  ;;  %v435_v35 = vmax.f32 %v368_v33, 0.0 }
  0xba   : > { %474 = vst [vmem:[%s944_s25 + $0x80] sm:$0xff] %v442_v30 }
  0xbb   : > { %482 = vst [vmem:[%s944_s25 + $0xc0] sm:$0xff] %v450_v31 }
  0xbc   : > { %459 = vst [vmem:[%s944_s25 + $0x8] sm:$0xff] %v427_v34 }
  0xbd   : > { %467 = vst [vmem:[%s944_s25 + $0x48] sm:$0xff] %v435_v35 }
  0xbf   : > { %v388_v36 = vpop.f32.mrf.mxu2  ;;  %v408_v37 = vpop.f32.mrf.mxu3 }
  0xc0   : > { %v443_v38 = vmax.f32 %v388_v36, 0.0  ;;  %v451_v39 = vmax.f32 %v408_v37, 0.0  ;;  %v351_v40 = vpop.f32.mrf.mxu0  ;;  %v371_v41 = vpop.f32.mrf.mxu1 }
  0xc1   : > { %v428_v42 = vmax.f32 %v351_v40, 0.0  ;;  %v436_v43 = vmax.f32 %v371_v41, 0.0 }
  0xc2   : > { %475 = vst [vmem:[%s944_s25 + $0x88] sm:$0xff] %v443_v38 }
  0xc3   : > { %483 = vst [vmem:[%s944_s25 + $0xc8] sm:$0xff] %v451_v39 }
  0xc4   : > { %460 = vst [vmem:[%s944_s25 + $0x10] sm:$0xff] %v428_v42 }
  0xc5   : > { %468 = vst [vmem:[%s944_s25 + $0x50] sm:$0xff] %v436_v43 }
  0xc7   : > { %v391_v44 = vpop.f32.mrf.mxu2  ;;  %v411_v45 = vpop.f32.mrf.mxu3 }
  0xc8   : > { %v444_v46 = vmax.f32 %v391_v44, 0.0  ;;  %v452_v47 = vmax.f32 %v411_v45, 0.0  ;;  %v353_v48 = vpop.f32.mrf.mxu0  ;;  %v373_v49 = vpop.f32.mrf.mxu1 }
  0xc9   : > { %v429_v50 = vmax.f32 %v353_v48, 0.0  ;;  %v437_v51 = vmax.f32 %v373_v49, 0.0 }
  0xca   : > { %476 = vst [vmem:[%s944_s25 + $0x90] sm:$0xff] %v444_v46 }
  0xcb   : > { %484 = vst [vmem:[%s944_s25 + $0xd0] sm:$0xff] %v452_v47 }
  0xcc   : > { %461 = vst [vmem:[%s944_s25 + $0x18] sm:$0xff] %v429_v50 }
  0xcd   : > { %469 = vst [vmem:[%s944_s25 + $0x58] sm:$0xff] %v437_v51 }
  0xcf   : > { %v393_v52 = vpop.f32.mrf.mxu2  ;;  %v413_v53 = vpop.f32.mrf.mxu3 }
  0xd0   : > { %v445_v54 = vmax.f32 %v393_v52, 0.0  ;;  %v453_v55 = vmax.f32 %v413_v53, 0.0  ;;  %v356_v56 = vpop.f32.mrf.mxu0  ;;  %v376_v57 = vpop.f32.mrf.mxu1 }
  0xd1   : > { %v430_v58 = vmax.f32 %v356_v56, 0.0  ;;  %v438_v59 = vmax.f32 %v376_v57, 0.0 }
  0xd2   : > { %477 = vst [vmem:[%s944_s25 + $0x98] sm:$0xff] %v445_v54 }
  0xd3   : > { %485 = vst [vmem:[%s944_s25 + $0xd8] sm:$0xff] %v453_v55 }
  0xd4   : > { %462 = vst [vmem:[%s944_s25 + $0x20] sm:$0xff] %v430_v58 }
  0xd5   : > { %470 = vst [vmem:[%s944_s25 + $0x60] sm:$0xff] %v438_v59 }
  0xd7   : > { %v396_v60 = vpop.f32.mrf.mxu2  ;;  %v416_v61 = vpop.f32.mrf.mxu3 }
  0xd8   : > { %v446_v62 = vmax.f32 %v396_v60, 0.0  ;;  %v454_v63 = vmax.f32 %v416_v61, 0.0  ;;  %v358_v0 = vpop.f32.mrf.mxu0  ;;  %v378_v1 = vpop.f32.mrf.mxu1 }
  0xd9   : > { %v431_v2 = vmax.f32 %v358_v0, 0.0  ;;  %v439_v3 = vmax.f32 %v378_v1, 0.0 }
  0xda   : > { %478 = vst [vmem:[%s944_s25 + $0xa0] sm:$0xff] %v446_v62 }
  0xdb   : > { %486 = vst [vmem:[%s944_s25 + $0xe0] sm:$0xff] %v454_v63 }
  0xdc   : > { %463 = vst [vmem:[%s944_s25 + $0x28] sm:$0xff] %v431_v2 }
  0xdd   : > { %471 = vst [vmem:[%s944_s25 + $0x68] sm:$0xff] %v439_v3 }
  0xdf   : > { %v398_v4 = vpop.f32.mrf.mxu2  ;;  %v418_v5 = vpop.f32.mrf.mxu3 }
  0xe0   : > { %v447_v6 = vmax.f32 %v398_v4, 0.0  ;;  %v455_v7 = vmax.f32 %v418_v5, 0.0  ;;  %v361_v8 = vpop.f32.mrf.mxu0  ;;  %v381_v9 = vpop.f32.mrf.mxu1 }
  0xe1   : > { %v432_v10 = vmax.f32 %v361_v8, 0.0  ;;  %v440_v11 = vmax.f32 %v381_v9, 0.0 }
  0xe2   : > { %479 = vst [vmem:[%s944_s25 + $0xa8] sm:$0xff] %v447_v6 }
  0xe3   : > { %487 = vst [vmem:[%s944_s25 + $0xe8] sm:$0xff] %v455_v7 }
  0xe4   : > { %464 = vst [vmem:[%s944_s25 + $0x30] sm:$0xff] %v432_v10 }
  0xe5   : > { %472 = vst [vmem:[%s944_s25 + $0x70] sm:$0xff] %v440_v11 }
  0xe7   : > { %v401_v12 = vpop.f32.mrf.mxu2  ;;  %v421_v13 = vpop.f32.mrf.mxu3 }
  0xe8   : > { %v448_v14 = vmax.f32 %v401_v12, 0.0  ;;  %v456_v15 = vmax.f32 %v421_v13, 0.0  ;;  %v363_v16 = vpop.f32.mrf.mxu0  ;;  %v383_v17 = vpop.f32.mrf.mxu1 }
  0xe9   : > { %v433_v18 = vmax.f32 %v363_v16, 0.0  ;;  %v441_v19 = vmax.f32 %v383_v17, 0.0 }
  0xea   : > { %480 = vst [vmem:[%s944_s25 + $0xb0] sm:$0xff] %v448_v14 }
  0xeb   : > { %488 = vst [vmem:[%s944_s25 + $0xf0] sm:$0xff] %v456_v15 }
  0xec   : > { %465 = vst [vmem:[%s944_s25 + $0x38] sm:$0xff] %v433_v18 }
  0xed   : > { %473 = vst [vmem:[%s944_s25 + $0x78] sm:$0xff] %v441_v19 }
  0xef   : > { %v403_v20 = vpop.f32.mrf.mxu2  ;;  %v423_v21 = vpop.f32.mrf.mxu3 }
  0xf0   : > { %v449_v22 = vmax.f32 %v403_v20, 0.0  ;;  %v457_v23 = vmax.f32 %v423_v21, 0.0 }
  0xf2   : > { %481 = vst [vmem:[%s944_s25 + $0xb8] sm:$0xff] %v449_v22 }
  0xf3   : > { %489 = vst [vmem:[%s944_s25 + $0xf8] sm:$0xff] %v457_v23 }
  0xf4   : > { %793 = shalt.err (!%p790_p3)
}
  0xf5   : > { %s830_s17 = smov 128   ;;  %s831_s21 = smov 8  }
  0xf6   : > { %725 = dma.vmem_to_hbm [thread:$0]  (%p885_p5), %s504_s30, 4096, %s506_s13, %s491_s3, %s830_s17, %s830_s17, %s831_s21  }
  0xf7 PF: > { %p731_p4 = scmp.ge.s32.totalorder %s828_s12, 2  ;;  %s520_s22 = sand.u32 1, %s816_s9  }
  0xf8   : > { %s521_s23 = scalar_lea.sflag [#allocation3], %s520_s22 }
  0xf9   : > { %p728_p7 = pnand %p731_p4, %p889_p6 }
  0xfb   : > { %p729_p8 = pneg %p728_p7 }
  0xfd   : > { %811 = dma.done.wait (%p729_p8), %s521_s23, 4096  }
  0xfe   : > { %813 = vsyncadd (%p729_p8), %s521_s23, 4294963200  ;;  %p12_p9 = scmp.ge.s32.totalorder %s872_s15, 4   ;;  %s1017_s9 = smov %s820_s10 }
  0xff   : > { %s1018_s10 = smov %s824_s11  ;;  %s1019_s11 = smov %s883_s18 }
 0x100   : > { %s1020_s12 = smov %s872_s15  ;;  %14 = sbr.rel (!%p12_p9) target bundleno = 3 (0x3), region = 63 }
 0x105   :  { %527 = vsyncpa [#allocation3], 1 }
 0x106   :  { %529 = vsyncpa [#allocation3 + $0x1], 1 }

</bundles_post_ra>
